<compile_context>
chip_gen: v7x
topology: tpu7x:2x2x1
jax: 0.10.0
libtpu: 0.0.40
codegen_flags: <defaults>
</compile_context>

<pallas_src>
from functools import partial

import jax
import jax.numpy as jnp
from jax.experimental import pallas as pl
from jax.experimental.pallas import tpu as pltpu

NEG_SLOPE = 0.01  # torch.nn.LeakyReLU default


def _leaky_relu(x):
    return jnp.where(x > 0, x, NEG_SLOPE * x)


def _round_up(n, m):
    return ((n + m - 1) // m) * m


def _pad2d(a, rows, cols):
    pr, pc = rows - a.shape[0], cols - a.shape[1]
    if pr == 0 and pc == 0:
        return a
    return jnp.pad(a, ((0, pr), (0, pc)))


def _tpu_generation_info():
    """(is_v7x, per-step VMEM planning budget, vmem_limit_bytes) from the device kind."""
    kind = ""
    try:
        kind = (jax.devices()[0].device_kind or "").lower()
    except Exception:
        pass
    if ("v7" in kind) or ("7x" in kind):
        # v7x: 64 MiB physical VMEM per TensorCore -> leave headroom for scratch.
        return True, 36 << 20, 48 << 20
    if any(g in kind for g in ("v4", "v5", "v6")):
        # 128 MiB physical VMEM: larger tiles / deeper buffering are free wins.
        return False, 80 << 20, 100 << 20
    # Unknown device: conservative settings that work everywhere.
    return False, 36 << 20, 48 << 20


def _pick_batch_tile(B, D_pad, E1_pad, E2_pad, in_bytes, out_bytes,
                     weight_bytes, vmem_budget, is_v7x, requested):
    """Batch tile scaled by the per-step VMEM footprint (not a hard 256 cap)."""
    if requested is not None:
        return max(8, _round_up(min(int(requested), _round_up(B, 8)), 8))
    # Per-row VMEM of the pipelined streams (x & out double-buffered) plus the f32
    # intermediates h1/h2 held once per step.
    per_row = 2 * D_pad * in_bytes + 2 * D_pad * out_bytes + 4 * (E1_pad + E2_pad)
    budget = max(vmem_budget - weight_bytes, per_row * 128)
    tile = min(1024, budget // per_row)
    tile = max(128, (tile // 128) * 128)
    padded_B = _round_up(B, 128)
    tile = min(tile, padded_B)
    # v7x has 2 TensorCores: split so both get grid steps.  v5e/v6e run the grid as a
    # serial loop, so splitting there only adds per-step overhead.
    if is_v7x and padded_B >= 256 and padded_B // tile < 2:
        tile = max(128, ((tile // 2) // 128) * 128)
    # Tiny batches: don't pad a handful of rows up to 128.
    if B < tile:
        tile = max(8, _round_up(B, 8))
    return tile


def autoencoder_kernel(x_ref, w1_ref, b1_ref, w2_ref, b2_ref, w3_ref, b3_ref, o_ref,
                       *, compute_dtype):
    # Fused 3-layer MLP on one batch tile.  Matmuls hit the MXU with f32 accumulation;
    # bias adds / LeakyReLU run on the VPU in f32; intermediates are re-cast to the
    # compute dtype (bf16 by default) before feeding the next matmul.
    x = x_ref[...].astype(compute_dtype)   # cast on the loaded tile (no wrapper pass)
    h1 = jnp.dot(x, w1_ref[...], preferred_element_type=jnp.float32) + b1_ref[...]
    h1 = _leaky_relu(h1).astype(compute_dtype)
    h2 = jnp.dot(h1, w2_ref[...], preferred_element_type=jnp.float32) + b2_ref[...]
    h2 = _leaky_relu(h2).astype(compute_dtype)
    out = jnp.dot(h2, w3_ref[...], preferred_element_type=jnp.float32) + b3_ref[...]
    o_ref[...] = out.astype(o_ref.dtype)


def prepare_params(params, *, compute_dtype=jnp.bfloat16):
    """One-time: pad feature dims to multiples of 128 (exact: leaky_relu(0)=0, zero
    weight rows/cols add 0) and cast weights to the compute dtype, biases to f32.

    params: w1 (D,E1), b1 (1,E1), w2 (E1,E2), b2 (1,E2), w3 (E2,D), b3 (1,D) -- weights
    stored as (in_features, out_features), i.e. transposed vs. PyTorch, so y = x @ W + b.
    """
    cd = jnp.dtype(compute_dtype)
    w1, b1 = params["w1"], params["b1"]
    w2, b2 = params["w2"], params["b2"]
    w3, b3 = params["w3"], params["b3"]
    D, E1 = w1.shape
    E2 = w2.shape[1]
    D_pad, E1_pad, E2_pad = (_round_up(d, 128) for d in (D, E1, E2))
    return {
        "w1": _pad2d(w1, D_pad, E1_pad).astype(cd),
        "b1": _pad2d(b1, 1, E1_pad).astype(jnp.float32),
        "w2": _pad2d(w2, E1_pad, E2_pad).astype(cd),
        "b2": _pad2d(b2, 1, E2_pad).astype(jnp.float32),
        "w3": _pad2d(w3, E2_pad, D_pad).astype(cd),
        "b3": _pad2d(b3, 1, D_pad).astype(jnp.float32),
    }


@partial(jax.jit, static_argnames=("compute_dtype", "out_dtype", "batch_tile",
                                   "is_v7x", "vmem_budget", "vmem_limit",
                                   "single_buffer_weights"))
def _forward_jit(x, w1p, b1p, w2p, b2p, w3p, b3p, *, compute_dtype, out_dtype,
                 batch_tile, is_v7x, vmem_budget, vmem_limit, single_buffer_weights):
    B, D = x.shape
    D_pad, E1_pad = w1p.shape
    E2_pad = w2p.shape[1]
    compute_dtype = jnp.dtype(compute_dtype)
    out_dtype = jnp.dtype(out_dtype)

    weight_bytes = sum(int(a.size) * a.dtype.itemsize
                       for a in (w1p, b1p, w2p, b2p, w3p, b3p))
    tile = _pick_batch_tile(B, D_pad, E1_pad, E2_pad,
                            x.dtype.itemsize, out_dtype.itemsize,
                            weight_bytes, vmem_budget, is_v7x, batch_tile)
    B_pad = _round_up(B, tile)

    if D == D_pad and B == B_pad:
        # Fast path: no extra HBM pass over x; the kernel casts the loaded tile.
        xp = x
    else:
        # Ragged shapes: single fused pad+cast pass (writes compute_dtype, not f32).
        xp = _pad2d(x, B_pad, D_pad).astype(compute_dtype)

    def _resident_spec(shape):
        index_map = lambda i: (0, 0)
        if single_buffer_weights:
            # Constant index_map -> double buffering buys nothing; halve the weights'
            # VMEM footprint (matters on v7x's 64 MiB VMEM for large input_dim).
            try:
                return pl.BlockSpec(shape, index_map, pipeline_mode=pl.Buffered(1))
            except TypeError:
                pass
        return pl.BlockSpec(shape, index_map)

    in_specs = [
        pl.BlockSpec((tile, D_pad), lambda i: (i, 0)),   # x tile (pipelined)
        _resident_spec((D_pad, E1_pad)),                 # w1 (resident)
        _resident_spec((1, E1_pad)),                     # b1
        _resident_spec((E1_pad, E2_pad)),                # w2
        _resident_spec((1, E2_pad)),                     # b2
        _resident_spec((E2_pad, D_pad)),                 # w3
        _resident_spec((1, D_pad)),                      # b3
    ]
    out_spec = pl.BlockSpec((tile, D_pad), lambda i: (i, 0))

    flops = 2 * B_pad * (D_pad * E1_pad + E1_pad * E2_pad + E2_pad * D_pad)
    bytes_accessed = int(
        xp.size * xp.dtype.itemsize
        + B_pad * D_pad * out_dtype.itemsize
        + weight_bytes
    )

    out_padded = pl.pallas_call(
        partial(autoencoder_kernel, compute_dtype=compute_dtype),
        out_shape=jax.ShapeDtypeStruct((B_pad, D_pad), out_dtype),
        grid_spec=pltpu.PrefetchScalarGridSpec(
            num_scalar_prefetch=0,
            grid=(B_pad // tile,),
            in_specs=in_specs,
            out_specs=out_spec,
        ),
        compiler_params=pltpu.CompilerParams(
            dimension_semantics=("parallel",),
            vmem_limit_bytes=vmem_limit,
        ),
        cost_estimate=pl.CostEstimate(
            flops=flops, transcendentals=0, bytes_accessed=bytes_accessed
        ),
    )(xp, w1p, b1p, w2p, b2p, w3p, b3p)

    return out_padded[:B, :D]


def autoencoder_forward(x, prepared, *, compute_dtype=jnp.bfloat16, out_dtype=None,
                        batch_tile=None):
    """x: (B, input_dim).  prepared: output of prepare_params() (padded/cast weights)."""
    is_v7x, vmem_budget, vmem_limit = _tpu_generation_info()
    out_dtype = x.dtype if out_dtype is None else out_dtype
    weight_bytes = sum(int(a.size) * a.dtype.itemsize for a in prepared.values())
    single_buffer = bool(is_v7x and weight_bytes > (4 << 20))
    return _forward_jit(
        x,
        prepared["w1"], prepared["b1"],
        prepared["w2"], prepared["b2"],
        prepared["w3"], prepared["b3"],
        compute_dtype=jnp.dtype(compute_dtype),
        out_dtype=jnp.dtype(out_dtype),
        batch_tile=batch_tile,
        is_v7x=is_v7x,
        vmem_budget=vmem_budget,
        vmem_limit=vmem_limit,
        single_buffer_weights=single_buffer,
    )


def init_params(key, input_dim, encoding_dim1=256, encoding_dim2=64):
    """Deterministic init mimicking torch.nn.Linear (uniform +/- 1/sqrt(fan_in))."""
    def linear(k, fan_in, fan_out):
        kw, kb = jax.random.split(k)
        bound = 1.0 / jnp.sqrt(fan_in)
        w = jax.random.uniform(kw, (fan_in, fan_out), jnp.float32, -bound, bound)
        b = jax.random.uniform(kb, (1, fan_out), jnp.float32, -bound, bound)
        return w, b

    k1, k2, k3 = jax.random.split(key, 3)
    w1, b1 = linear(k1, input_dim, encoding_dim1)
    w2, b2 = linear(k2, encoding_dim1, encoding_dim2)
    w3, b3 = linear(k3, encoding_dim2, input_dim)
    return {"w1": w1, "b1": b1, "w2": w2, "b2": b2, "w3": w3, "b3": b3}


def reference_forward(x, p, compute_dtype=jnp.float32, out_dtype=None):
    """Pure-JAX reference mirroring the kernel's dtype flow (f32 accumulation)."""
    cd = jnp.dtype(compute_dtype)
    out_dtype = x.dtype if out_dtype is None else out_dtype
    xc = x.astype(cd)
    h1 = jnp.dot(xc, p["w1"].astype(cd), preferred_element_type=jnp.float32) + p["b1"]
    h1 = _leaky_relu(h1).astype(cd)
    h2 = jnp.dot(h1, p["w2"].astype(cd), preferred_element_type=jnp.float32) + p["b2"]
    h2 = _leaky_relu(h2).astype(cd)
    out = jnp.dot(h2, p["w3"].astype(cd), preferred_element_type=jnp.float32) + p["b3"]
    return out.astype(out_dtype)


if __name__ == "__main__":
    key = jax.random.PRNGKey(0)
    kx1, kx2, kp = jax.random.split(key, 3)

    # Case 1: ragged input_dim (exercises the fused pad+cast path), f32 output.
    INPUT_DIM = 100   # deliberately not a multiple of 128
    BATCH = 8
    params = init_params(kp, INPUT_DIM, encoding_dim1=256, encoding_dim2=64)
    prepared = prepare_params(params, compute_dtype=jnp.bfloat16)
    x = jax.random.normal(kx1, (BATCH, INPUT_DIM), jnp.float32)

    out = jax.block_until_ready(autoencoder_forward(x, prepared))
    ref = reference_forward(x, params, compute_dtype=jnp.bfloat16)
    assert out.shape == (BATCH, INPUT_DIM) and out.dtype == jnp.float32
    assert jnp.allclose(out, ref, atol=1e-2, rtol=1e-2), "ragged-D bf16 path mismatch"

    # Case 2: lane-aligned input_dim (x fed straight into the kernel, zero wrapper
    # passes) with bf16 output (halves the dominant HBM store).
    INPUT_DIM2 = 128
    BATCH2 = 256
    params2 = init_params(kp, INPUT_DIM2, encoding_dim1=256, encoding_dim2=64)
    prepared2 = prepare_params(params2, compute_dtype=jnp.bfloat16)
    x2 = jax.random.normal(kx2, (BATCH2, INPUT_DIM2), jnp.float32)

    out2 = jax.block_until_ready(
        autoencoder_forward(x2, prepared2, out_dtype=jnp.bfloat16))
    ref2 = reference_forward(x2, params2, compute_dtype=jnp.bfloat16,
                             out_dtype=jnp.bfloat16)
    assert out2.shape == (BATCH2, INPUT_DIM2) and out2.dtype == jnp.bfloat16
    assert jnp.allclose(out2.astype(jnp.float32), ref2.astype(jnp.float32),
                        atol=2e-2, rtol=2e-2), "aligned-D bf16-out path mismatch"

    print("KERNEL_OK")
</pallas_src>

<mosaic_0001>
module attributes {stable_mosaic.version = 11 : i64} {
  func.func @autoencoder_kernel(%arg0: i32, %arg1: memref<8x128xbf16, #tpu.memory_space<vmem>>, %arg2: memref<128x256xbf16, #tpu.memory_space<vmem>>, %arg3: memref<1x256xf32, #tpu.memory_space<vmem>>, %arg4: memref<256x128xbf16, #tpu.memory_space<vmem>>, %arg5: memref<1x128xf32, #tpu.memory_space<vmem>>, %arg6: memref<128x128xbf16, #tpu.memory_space<vmem>>, %arg7: memref<1x128xf32, #tpu.memory_space<vmem>>, %arg8: memref<8x128xf32, #tpu.memory_space<vmem>>) attributes {dimension_semantics = [#tpu.dimension_semantics<parallel>], iteration_bounds = array<i64: 1>, scalar_prefetch = 0 : i64, scratch_operands = 0 : i64, tpu.core_type = #tpu.core_type<tc>, window_params = [{transform_indices = @transform_0, window_bounds = array<i64: 8, 128>}, {pipeline_mode = #tpu.pipeline_mode<synchronous>, transform_indices = @transform_1, window_bounds = array<i64: 128, 256>}, {pipeline_mode = #tpu.pipeline_mode<synchronous>, transform_indices = @transform_2, window_bounds = array<i64: 1, 256>}, {pipeline_mode = #tpu.pipeline_mode<synchronous>, transform_indices = @transform_3, window_bounds = array<i64: 256, 128>}, {pipeline_mode = #tpu.pipeline_mode<synchronous>, transform_indices = @transform_4, window_bounds = array<i64: 1, 128>}, {pipeline_mode = #tpu.pipeline_mode<synchronous>, transform_indices = @transform_5, window_bounds = array<i64: 128, 128>}, {pipeline_mode = #tpu.pipeline_mode<synchronous>, transform_indices = @transform_6, window_bounds = array<i64: 1, 128>}, {transform_indices = @transform_7, window_bounds = array<i64: 8, 128>}]} {
    %c0 = arith.constant 0 : index
    %c0_0 = arith.constant 0 : index
    %0 = vector.load %arg1[%c0, %c0_0] : memref<8x128xbf16, #tpu.memory_space<vmem>>, vector<8x128xbf16>
    %c0_1 = arith.constant 0 : index
    %c0_2 = arith.constant 0 : index
    %1 = vector.load %arg2[%c0_1, %c0_2] : memref<128x256xbf16, #tpu.memory_space<vmem>>, vector<128x256xbf16>
    %cst = arith.constant dense<0.000000e+00> : vector<8x256xf32>
    %2 = tpu.matmul %0, %1, %cst {dimension_numbers = #tpu.dot_dimension_numbers<[1], [0], [0], [1], [0, 0, 1, 1], [], []>} : vector<8x128xbf16>, vector<128x256xbf16>, vector<8x256xf32> -> vector<8x256xf32>
    %c0_3 = arith.constant 0 : index
    %c0_4 = arith.constant 0 : index
    %3 = vector.load %arg3[%c0_3, %c0_4] : memref<1x256xf32, #tpu.memory_space<vmem>>, vector<1x256xf32>
    %4 = vector.broadcast %3 : vector<1x256xf32> to vector<8x256xf32>
    %5 = arith.addf %2, %4 : vector<8x256xf32>
    %cst_5 = arith.constant 0.000000e+00 : f32
    %6 = vector.broadcast %cst_5 : f32 to vector<8x256xf32>
    %7 = arith.cmpf ogt, %5, %6 : vector<8x256xf32>
    %cst_6 = arith.constant 0.00999999977 : f32
    %8 = vector.broadcast %cst_6 : f32 to vector<8x256xf32>
    %9 = arith.mulf %8, %5 : vector<8x256xf32>
    %10 = arith.select %7, %5, %9 : vector<8x256xi1>, vector<8x256xf32>
    %11 = arith.truncf %10 : vector<8x256xf32> to vector<8x256xbf16>
    %c0_7 = arith.constant 0 : index
    %c0_8 = arith.constant 0 : index
    %12 = vector.load %arg4[%c0_7, %c0_8] : memref<256x128xbf16, #tpu.memory_space<vmem>>, vector<256x128xbf16>
    %cst_9 = arith.constant dense<0.000000e+00> : vector<8x128xf32>
    %13 = tpu.matmul %11, %12, %cst_9 {dimension_numbers = #tpu.dot_dimension_numbers<[1], [0], [0], [1], [0, 0, 1, 1], [], []>} : vector<8x256xbf16>, vector<256x128xbf16>, vector<8x128xf32> -> vector<8x128xf32>
    %c0_10 = arith.constant 0 : index
    %c0_11 = arith.constant 0 : index
    %14 = vector.load %arg5[%c0_10, %c0_11] : memref<1x128xf32, #tpu.memory_space<vmem>>, vector<1x128xf32>
    %15 = vector.broadcast %14 : vector<1x128xf32> to vector<8x128xf32>
    %16 = arith.addf %13, %15 : vector<8x128xf32>
    %cst_12 = arith.constant 0.000000e+00 : f32
    %17 = vector.broadcast %cst_12 : f32 to vector<8x128xf32>
    %18 = arith.cmpf ogt, %16, %17 : vector<8x128xf32>
    %cst_13 = arith.constant 0.00999999977 : f32
    %19 = vector.broadcast %cst_13 : f32 to vector<8x128xf32>
    %20 = arith.mulf %19, %16 : vector<8x128xf32>
    %21 = arith.select %18, %16, %20 : vector<8x128xi1>, vector<8x128xf32>
    %22 = arith.truncf %21 : vector<8x128xf32> to vector<8x128xbf16>
    %c0_14 = arith.constant 0 : index
    %c0_15 = arith.constant 0 : index
    %23 = vector.load %arg6[%c0_14, %c0_15] : memref<128x128xbf16, #tpu.memory_space<vmem>>, vector<128x128xbf16>
    %cst_16 = arith.constant dense<0.000000e+00> : vector<8x128xf32>
    %24 = tpu.matmul %22, %23, %cst_16 {dimension_numbers = #tpu.dot_dimension_numbers<[1], [0], [0], [1], [0, 0, 1, 1], [], []>} : vector<8x128xbf16>, vector<128x128xbf16>, vector<8x128xf32> -> vector<8x128xf32>
    %c0_17 = arith.constant 0 : index
    %c0_18 = arith.constant 0 : index
    %25 = vector.load %arg7[%c0_17, %c0_18] : memref<1x128xf32, #tpu.memory_space<vmem>>, vector<1x128xf32>
    %26 = vector.broadcast %25 : vector<1x128xf32> to vector<8x128xf32>
    %27 = arith.addf %24, %26 : vector<8x128xf32>
    %c0_19 = arith.constant 0 : index
    %c0_20 = arith.constant 0 : index
    %28 = vector.load %arg8[%c0_19, %c0_20] : memref<8x128xf32, #tpu.memory_space<vmem>>, vector<8x128xf32>
    tpu.vector_store %arg8[%c0_19, %c0_20], %27 {strides = array<i32>} : memref<8x128xf32, #tpu.memory_space<vmem>>, vector<8x128xf32>,
    return
  }
  func.func @transform_0(%arg0: i32) -> (i32, i32) {
    %c0_i32 = arith.constant 0 : i32
    %c0_i32_0 = arith.constant 0 : i32
    return %arg0, %c0_i32 : i32, i32
  }
  func.func @transform_1(%arg0: i32) -> (i32, i32) {
    %c0_i32 = arith.constant 0 : i32
    %c0_i32_0 = arith.constant 0 : i32
    %c0_i32_1 = arith.constant 0 : i32
    return %c0_i32, %c0_i32_0 : i32, i32
  }
  func.func @transform_2(%arg0: i32) -> (i32, i32) {
    %c0_i32 = arith.constant 0 : i32
    %c0_i32_0 = arith.constant 0 : i32
    %c0_i32_1 = arith.constant 0 : i32
    return %c0_i32, %c0_i32_0 : i32, i32
  }
  func.func @transform_3(%arg0: i32) -> (i32, i32) {
    %c0_i32 = arith.constant 0 : i32
    %c0_i32_0 = arith.constant 0 : i32
    %c0_i32_1 = arith.constant 0 : i32
    return %c0_i32, %c0_i32_0 : i32, i32
  }
  func.func @transform_4(%arg0: i32) -> (i32, i32) {
    %c0_i32 = arith.constant 0 : i32
    %c0_i32_0 = arith.constant 0 : i32
    %c0_i32_1 = arith.constant 0 : i32
    return %c0_i32, %c0_i32_0 : i32, i32
  }
  func.func @transform_5(%arg0: i32) -> (i32, i32) {
    %c0_i32 = arith.constant 0 : i32
    %c0_i32_0 = arith.constant 0 : i32
    %c0_i32_1 = arith.constant 0 : i32
    return %c0_i32, %c0_i32_0 : i32, i32
  }
  func.func @transform_6(%arg0: i32) -> (i32, i32) {
    %c0_i32 = arith.constant 0 : i32
    %c0_i32_0 = arith.constant 0 : i32
    %c0_i32_1 = arith.constant 0 : i32
    return %c0_i32, %c0_i32_0 : i32, i32
  }
  func.func @transform_7(%arg0: i32) -> (i32, i32) {
    %c0_i32 = arith.constant 0 : i32
    %c0_i32_0 = arith.constant 0 : i32
    return %arg0, %c0_i32 : i32, i32
  }
}

</mosaic_0001>

<bundles_post_ra>
// kernel: _forward_jit.1
= control target key start
LH: loop header
LB: loop body
LE: loop exit
PB: predicated region body
PF: predicated region fallthrough
CT: control target
= control target key end

     0   :  { %12 = vsyncpa [#allocation3], 0  ;;  %s897_s0 = inlined_call_operand.vmem [shape: bf16[8,128], index: 0, kind: input, shape index: {}]   ;;  %s898_s1 = inlined_call_operand.hbm [shape: bf16[128,256], index: 1, kind: input, shape index: {}]   ;;  %s899_s2 = inlined_call_operand.vmem [shape: f32[1,256], index: 2, kind: input, shape index: {}]   ;;  %s900_s3 = inlined_call_operand.hbm [shape: bf16[256,128], index: 3, kind: input, shape index: {}]   ;;  %s901_s4 = inlined_call_operand.vmem [shape: f32[1,128], index: 4, kind: input, shape index: {}]   ;;  %s902_s5 = inlined_call_operand.hbm [shape: bf16[128,128], index: 5, kind: input, shape index: {}]   ;;  %s903_s6 = inlined_call_operand.vmem [shape: f32[1,128], index: 6, kind: input, shape index: {}]   ;;  %s904_s7 = inlined_call_operand.hbm [shape: f32[8,128], index: 7, kind: output, shape index: {}]  }
   0x1   :  { %13 = vsyncpa [#allocation6], 0 }
   0x2   :  { %14 = vsyncpa [#allocation4], 0  ;;  %s780_s24 = smov [#allocation5]   ;;  %s686_s28 = scalar_lea.hbm %s900_s3, 2048 }
   0x3   :  { %s36_s25 = sshll.u32 %s780_s24, 4  ;;  %p687_p0 = scmp.ne.s32.totalorder %s900_s3, %s686_s28  ;;  %s37_s25 = int_to_ptr.vmem [resolvable:$true] %s36_s25 }
   0x4   :  { %p690_p1 = scmp.lt.u32.totalorder %s686_s28, %s900_s3 }
   0x6   :  { %p692_p2 = pnand %p690_p1, %p687_p0 }
   0x8   :  { %695 = shalt.err (!%p692_p2)
}
   0x9   :  { %s696_s10 = scalar_lea.vmem %s37_s25, 2048  ;;  %p701_p4 = scmp.lt.s32.totalorder %s37_s25, %s37_s25 }
   0xa   :  { %p697_p3 = scmp.ne.s32.totalorder %s37_s25, %s696_s10  ;;  %p702_p5 = scmp.lt.s32.totalorder %s696_s10, %s696_s10 }
   0xc   :  { %p703_p6 = por %p702_p5, %p701_p4 }
   0xe   :  { %p704_p7 = pnand %p703_p6, %p697_p3 }
  0x10   :  { %707 = shalt.err (!%p704_p7)
}
  0x11   :  { %s781_s11 = smov 64   ;;  %s782_s12 = smov 4  }
  0x12   :  { %42 = dma.hbm_to_vmem [thread:$0]  %s900_s3, 2048, %s37_s25, [#allocation6], %s781_s11, %s781_s11, %s782_s12  }
  0x13   :  { %s783_s15 = smov [#allocation2]   ;;  %s708_s19 = scalar_lea.hbm %s898_s1, 2048 }
  0x14   :  { %s22_s16 = sshll.u32 %s783_s15, 4  ;;  %p709_p8 = scmp.ne.s32.totalorder %s898_s1, %s708_s19  ;;  %s23_s16 = int_to_ptr.vmem [resolvable:$true] %s22_s16 }
  0x15   :  { %p712_p9 = scmp.lt.u32.totalorder %s708_s19, %s898_s1 }
  0x17   :  { %p714_p10 = pnand %p712_p9, %p709_p8 }
  0x19   :  { %717 = shalt.err (!%p714_p10)
}
  0x1a   :  { %s718_s24 = scalar_lea.vmem %s23_s16, 2048  ;;  %p723_p12 = scmp.lt.s32.totalorder %s23_s16, %s23_s16 }
  0x1b   :  { %p719_p11 = scmp.ne.s32.totalorder %s23_s16, %s718_s24  ;;  %p724_p13 = scmp.lt.s32.totalorder %s718_s24, %s718_s24 }
  0x1d   :  { %p725_p0 = por %p724_p13, %p723_p12 }
  0x1f   :  { %p726_p1 = pnand %p725_p0, %p719_p11 }
  0x21   :  { %729 = shalt.err (!%p726_p1)
}
  0x22   :  { %s784_s3 = smov 128   ;;  %s785_s25 = smov 8  }
  0x23   :  { %28 = dma.hbm_to_vmem [thread:$0]  %s898_s1, 2048, %s23_s16, [#allocation3], %s784_s3, %s784_s3, %s785_s25  }
  0x24   :  { %s786_s28 = smov [#allocation7]   ;;  %s730_s9 = scalar_lea.hbm %s902_s5, 1024 }
  0x25   :  { %s50_s29 = sshll.u32 %s786_s28, 4  ;;  %p731_p2 = scmp.ne.s32.totalorder %s902_s5, %s730_s9  ;;  %s51_s29 = int_to_ptr.vmem [resolvable:$true] %s50_s29 }
  0x26   :  { %p734_p3 = scmp.lt.u32.totalorder %s730_s9, %s902_s5 }
  0x28   :  { %p736_p4 = pnand %p734_p3, %p731_p2 }
  0x2a   :  { %739 = shalt.err (!%p736_p4)
}
  0x2b   :  { %s740_s17 = scalar_lea.vmem %s51_s29, 1024  ;;  %p745_p6 = scmp.lt.s32.totalorder %s51_s29, %s51_s29 }
  0x2c   :  { %p741_p5 = scmp.ne.s32.totalorder %s51_s29, %s740_s17  ;;  %p746_p7 = scmp.lt.s32.totalorder %s740_s17, %s740_s17 }
  0x2e   :  { %p747_p8 = por %p746_p7, %p745_p6 }
  0x30   :  { %p748_p9 = pnand %p747_p8, %p741_p5 }
  0x32   :  { %751 = shalt.err (!%p748_p9)
}
  0x33   :  { %56 = dma.hbm_to_vmem [thread:$0]  %s902_s5, 1024, %s51_s29, [#allocation6], %s781_s11, %s781_s11, %s782_s12  }
  0x34   :  { %774 = dma.done.wait [#allocation3], 2048  }
  0x35   :  { %775 = vsyncadd [#allocation3], 4294965248 }
  0x36   :  { %776 = dma.done.wait [#allocation6], 3072  }
  0x37   :  { %777 = vsyncadd [#allocation6], 4294964224  ;;  %v787_v0 = vmov 0   ;;  %v638_v1 = vld [vmem:[#allocation2 + $0x4] ss:$8 sps:$4 sm:$0xff]   ;;  %v666_v15 = vld [vmem:[#allocation5 + $0x50] sm:$0xff]   ;;  %v88_v40 = vlaneseq }
  0x38   :  { %210 = vmatprep.mubr.bf16.mxu0 %v787_v0  ;;  %v640_v2 = vld [vmem:[#allocation2] ss:$8 sps:$4 sm:$0xff]   ;;  %178 = vmatprep.subr.bf16.mxu0 %v638_v1  ;;  %v641_v3 = vld [vmem:[#allocation2 + $0x14] ss:$8 sps:$4 sm:$0xff]   ;;  %v643_v4 = vld [vmem:[#allocation2 + $0x10] ss:$8 sps:$4 sm:$0xff]  }
  0x39   :  { %179 = vmatpush1.bf16.msra.mxu0 %v640_v2  ;;  %v644_v5 = vld [vmem:[#allocation2 + $0x24] ss:$8 sps:$4 sm:$0xff]   ;;  %v646_v6 = vld [vmem:[#allocation2 + $0x20] ss:$8 sps:$4 sm:$0xff]   ;;  %v647_v7 = vld [vmem:[#allocation2 + $0x34] ss:$8 sps:$4 sm:$0xff]  }
  0x3a   :  { %180 = vmatprep.subr.bf16.mxu0 %v641_v3  ;;  %v649_v8 = vld [vmem:[#allocation2 + $0x30] ss:$8 sps:$4 sm:$0xff]   ;;  %v650_v9 = vld [vmem:[#allocation2 + $0x44] ss:$8 sps:$4 sm:$0xff]   ;;  %v652_v12 = vld [vmem:[#allocation2 + $0x40] ss:$8 sps:$4 sm:$0xff]  }
  0x3b   :  { %v662_v10 = vld [vmem:[#allocation5 + $0x40] sm:$0xff]   ;;  %v664_v13 = vld [vmem:[#allocation5 + $0x48] sm:$0xff]   ;;  %v653_v16 = vld [vmem:[#allocation2 + $0x54] ss:$8 sps:$4 sm:$0xff]   ;;  %v788_v35 = vmov 0.0   ;;  %v89_v41 = vshrl.u32 %v88_v40, 7 }
  0x3c   :  { %v663_v11 = vld [vmem:[#allocation5] sm:$0xff]   ;;  %576 = vmatprep.subr.bf16.mxu1 %v662_v10  ;;  %v665_v14 = vld [vmem:[#allocation5 + $0x8] sm:$0xff]   ;;  %v655_v17 = vld [vmem:[#allocation2 + $0x50] ss:$8 sps:$4 sm:$0xff]   ;;  %vm789_vm2 = vmmov 0   ;;  %s790_s21 = smov [#allocation8]  }
  0x3d   :  { %181 = vmatpush1.bf16.msra.mxu0 %v643_v4  ;;  %577 = vmatpush3.bf16.msra.mxu1 %v663_v11  ;;  %v667_v18 = vld [vmem:[#allocation5 + $0x10] sm:$0xff]   ;;  %v668_v19 = vld [vmem:[#allocation5 + $0x58] sm:$0xff]   ;;  %v656_v20 = vld [vmem:[#allocation2 + $0x64] ss:$8 sps:$4 sm:$0xff]   ;;  %v90_v42 = vsub.s32 0, %v89_v41  ;;  %v94_v44 = vsub.s32 1, %v89_v41 }
  0x3e   :  { %182 = vmatprep.subr.bf16.mxu0 %v644_v5  ;;  %578 = vmatprep.subr.bf16.mxu1 %v664_v13  ;;  %v658_v21 = vld [vmem:[#allocation2 + $0x60] ss:$8 sps:$4 sm:$0xff]   ;;  %v659_v22 = vld [vmem:[#allocation2 + $0x74] ss:$8 sps:$4 sm:$0xff]   ;;  %v661_v26 = vld [vmem:[#allocation2 + $0x70] ss:$8 sps:$4 sm:$0xff]  }
  0x3f   :  { %v669_v23 = vld [vmem:[#allocation5 + $0x18] sm:$0xff]   ;;  %v670_v24 = vld [vmem:[#allocation5 + $0x60] sm:$0xff]   ;;  %v672_v27 = vld [vmem:[#allocation5 + $0x68] sm:$0xff]   ;;  %s524_s22 = sshll.u32 %s790_s21, 4  ;;  %s525_s22 = int_to_ptr.vmem [resolvable:$true] %s524_s22 }
  0x40   :  { %v671_v25 = vld [vmem:[#allocation5 + $0x20] sm:$0xff]   ;;  %v673_v28 = vld [vmem:[#allocation5 + $0x28] sm:$0xff]   ;;  %v674_v30 = vld [vmem:[#allocation5 + $0x70] sm:$0xff]   ;;  %p757_p11 = scmp.lt.s32.totalorder %s525_s22, %s525_s22 }
  0x41   :  { %183 = vmatpush1.bf16.msra.mxu0 %v646_v6  ;;  %579 = vmatpush3.bf16.msra.mxu1 %v665_v14  ;;  %v69_v29 = vld [vmem:[%s897_s0] sm:$0xf]  ;;  %v675_v31 = vld [vmem:[#allocation5 + $0x30] sm:$0xff]   ;;  %v676_v32 = vld [vmem:[#allocation5 + $0x78] sm:$0xff]  }
  0x42   :  { %184 = vmatprep.subr.bf16.mxu0 %v647_v7  ;;  %580 = vmatprep.subr.bf16.mxu1 %v666_v15  ;;  %v677_v33 = vld [vmem:[#allocation5 + $0x38] sm:$0xff]   ;;  %v678_v34 = vld [vmem:[#allocation7] sm:$0xff]   ;;  %v679_v36 = vld [vmem:[#allocation7 + $0x8] sm:$0xff]  }
  0x43   :  { %v680_v37 = vld [vmem:[#allocation7 + $0x10] sm:$0xff]   ;;  %v681_v38 = vld [vmem:[#allocation7 + $0x18] sm:$0xff]   ;;  %v682_v39 = vld [vmem:[#allocation7 + $0x20] sm:$0xff]  }
  0x44   :  { %v86_v43 = vld [vmem:[%s899_s2] sm:$0x3]  ;;  %v683_v59 = vld [vmem:[#allocation7 + $0x28] sm:$0xff]   ;;  %v684_v60 = vld [vmem:[#allocation7 + $0x30] sm:$0xff]  }
  0x45   :  { %185 = vmatpush1.bf16.msra.mxu0 %v649_v8  ;;  %581 = vmatpush3.bf16.msra.mxu1 %v667_v18  ;;  %v91_v45 = vrot.slane %v86_v43, %v90_v42  ;;  %v95_v46 = vrot.slane %v86_v43, %v94_v44  ;;  %v685_v61 = vld [vmem:[#allocation7 + $0x38] sm:$0xff]   ;;  %v550_v63 = vld [vmem:[%s901_s4] ss:$0 sm:$0xff]  ;;  %s752_s4 = scalar_lea.vmem %s525_s22, 128 }
  0x46   :  { %186 = vmatprep.subr.bf16.mxu0 %v650_v9  ;;  %582 = vmatprep.subr.bf16.mxu1 %v668_v19  ;;  %v567_v8 = vld [vmem:[%s903_s6] ss:$0 sm:$0xff]  ;;  %p753_p10 = scmp.ne.s32.totalorder %s525_s22, %s752_s4  ;;  %p758_p12 = scmp.lt.s32.totalorder %s752_s4, %s752_s4 }
  0x48   :  { %p759_p13 = por %p758_p12, %p757_p11 }
  0x49   :  { %187 = vmatpush1.bf16.msra.mxu0 %v652_v12  ;;  %583 = vmatpush3.bf16.msra.mxu1 %v669_v23 }
  0x4a   :  { %188 = vmatprep.subr.bf16.mxu0 %v653_v16  ;;  %584 = vmatprep.subr.bf16.mxu1 %v670_v24  ;;  %p760_p0 = pnand %p759_p13, %p753_p10 }
  0x4d   :  { %189 = vmatpush1.bf16.msra.mxu0 %v655_v17  ;;  %585 = vmatpush3.bf16.msra.mxu1 %v671_v25 }
  0x4e   :  { %190 = vmatprep.subr.bf16.mxu0 %v656_v20  ;;  %586 = vmatprep.subr.bf16.mxu1 %v672_v27 }
  0x51   :  { %191 = vmatpush1.bf16.msra.mxu0 %v658_v21  ;;  %587 = vmatpush3.bf16.msra.mxu1 %v673_v28 }
  0x52   :  { %192 = vmatprep.subr.bf16.mxu0 %v659_v22  ;;  %588 = vmatprep.subr.bf16.mxu1 %v674_v30 }
  0x55   :  { %193 = vmatpush1.bf16.msra.mxu0 %v661_v26  ;;  %589 = vmatpush3.bf16.msra.mxu1 %v675_v31 }
  0x56   :  { %590 = vmatprep.subr.bf16.mxu1 %v676_v32  ;;  %607 = vmatprep.subr.bf16.mxu0 %v788_v35 }
  0x58   :  { %211 = vmatmul.mubr.bf16.vlgmr.msra.gmra.mrb[0].mxu0 %v69_v29 }
  0x59   :  { %591 = vmatpush3.bf16.msra.mxu1 %v677_v33  ;;  %608 = vmatpush3.bf16.msra.mxu0 %v678_v34 }
  0x5a   :  { %609 = vmatprep.subr.bf16.mxu0 %v788_v35  ;;  %623 = vmatprep.mubr.msk.bf16.mxu0 %vm789_vm2, %v788_v35 }
  0x5d   :  { %610 = vmatpush3.bf16.msra.mxu0 %v679_v36 }
  0x5e   :  { %611 = vmatprep.subr.bf16.mxu0 %v788_v35 }
  0x61   :  { %612 = vmatpush3.bf16.msra.mxu0 %v680_v37 }
  0x62   :  { %613 = vmatprep.subr.bf16.mxu0 %v788_v35 }
  0x65   :  { %614 = vmatpush3.bf16.msra.mxu0 %v681_v38 }
  0x66   :  { %615 = vmatprep.subr.bf16.mxu0 %v788_v35 }
  0x69   :  { %616 = vmatpush3.bf16.msra.mxu0 %v682_v39 }
  0x6a   :  { %617 = vmatprep.subr.bf16.mxu0 %v788_v35 }
  0x6d   :  { %618 = vmatpush3.bf16.msra.mxu0 %v683_v59 }
  0x6e   :  { %619 = vmatprep.subr.bf16.mxu0 %v788_v35 }
  0x71   :  { %620 = vmatpush3.bf16.msra.mxu0 %v684_v60 }
  0x72   :  { %621 = vmatprep.subr.bf16.mxu0 %v788_v35 }
  0x75   :  { %622 = vmatpush3.bf16.msra.mxu0 %v685_v61 }
 0x12b   :  { %v212_v47 = vpop.f32.mrb[0].mxu0 }
 0x12c   :  { %v213_v48 = vadd.f32 %v212_v47, %v91_v45  ;;  %v214_v49 = vpop.f32.mrb[1].mxu0 }
 0x12d   :  { %v215_v50 = vadd.f32 %v214_v49, %v95_v46  ;;  %v216_v51 = vpop.f32.mrb[2].mxu0 }
 0x12e   :  { %vm219_vm0 = vcmp.gt.f32.partialorder %v213_v48, 0.0  ;;  %v221_v52 = vmul.f32 0.01, %v213_v48  ;;  %v217_v53 = vpop.f32.mrb[3].mxu0 }
 0x12f   :  { %vm220_vm1 = vcmp.gt.f32.partialorder %v215_v50, 0.0  ;;  %v222_v54 = vmul.f32 0.01, %v215_v50 }
 0x130   :  { %v223_v55 = vsel %vm219_vm0, %v213_v48, %v221_v52 }
 0x131   :  { %v224_v56 = vsel %vm220_vm1, %v215_v50, %v222_v54  ;;  %v225_v58 = vpack.c.bf16 %v223_v55, %v223_v55 }
 0x132   :  { %v226_v57 = vpack.c.bf16 %v224_v56, %v224_v56 }
 0x134   :  { %394 = vmatprep.mubr.bf16.mxu1 %v226_v57 }
 0x135   :  { %395 = vmatmul.mubr.bf16.vlgmr.msra.gmra.mrb[0].mxu1 %v225_v58 }
 0x208   :  { %v592_v62 = vpop.f32.mrb[0].mxu1 }
 0x209   :  { %v593_v0 = vpop.f32.mrb[1].mxu1 }
 0x20a   :  { %v594_v1 = vadd.f32 %v593_v0, %v592_v62  ;;  %v595_v2 = vpop.f32.mrb[2].mxu1 }
 0x20b   :  { %v596_v3 = vpop.f32.mrb[3].mxu1 }
 0x20c   :  { %v397_v4 = vadd.f32 %v594_v1, %v550_v63 }
 0x20e   :  { %vm402_vm3 = vcmp.gt.f32.partialorder %v397_v4, 0.0  ;;  %v403_v5 = vmul.f32 0.01, %v397_v4 }
 0x210   :  { %v404_v6 = vsel %vm402_vm3, %v397_v4, %v403_v5 }
 0x211   :  { %v405_v7 = vpack.c.bf16 %v404_v6, %v404_v6 }
 0x213   :  { %624 = vmatmul.mubr.bf16.vlgmr.msra.gmra.mrb[4].mxu0 %v405_v7 }
 0x2e6   :  { %v511_v9 = vpop.f32.mrb[4].mxu0 }
 0x2e7   :  { %v512_v10 = vadd.f32 %v567_v8, %v511_v9  ;;  %v625_v11 = vpop.f32.mrb[5].mxu0 }
 0x2e8   :  { %v514_v12 = vpop.f32.mrb[6].mxu0 }
 0x2e9   :  { %517 = vst [vmem:[#allocation8] sm:$0xff] %v512_v10  ;;  %v626_v13 = vpop.f32.mrb[7].mxu0 }
 0x2ea   :  { %763 = shalt.err (!%p760_p0)
}
 0x2eb   :  { %s764_s6 = scalar_lea.hbm %s904_s7, 128 }
 0x2ec   :  { %p765_p1 = scmp.ne.s32.totalorder %s904_s7, %s764_s6  ;;  %p768_p2 = scmp.lt.u32.totalorder %s764_s6, %s904_s7 }
 0x2ee   :  { %p770_p3 = pnand %p768_p2, %p765_p1 }
 0x2f0   :  { %773 = shalt.err (!%p770_p3)
}
 0x2f1   :  { %527 = dma.vmem_to_hbm [thread:$0]  %s525_s22, 128, %s904_s7, [#allocation4]  }
 0x2f2   :  { %778 = dma.done.wait [#allocation4], 128  }
 0x2f3   :  { %779 = vsyncadd [#allocation4], 4294967168 }
 0x2f4   :  { %531 = vsyncpa [#allocation3], 1 }
 0x2f5   :  { %532 = vsyncpa [#allocation6], 1 }
 0x2f6   :  { %533 = vsyncpa [#allocation4], 1 }

</bundles_post_ra>
